<compile_context>
chip_gen: v7x
topology: tpu7x:2x2x1
jax: 0.10.0
libtpu: 0.0.40
codegen_flags: <defaults>
</compile_context>

<pallas_src>
import functools
import math

import jax
import jax.numpy as jnp
from jax.experimental import pallas as pl
from jax.experimental.pallas import tpu as pltpu


def _round_up(v, m):
    return (v + m - 1) // m * m


def qnetwork_kernel(x_ref, w_ref, vb_ref, o_ref, *, hidden):
    H = hidden
    x = x_ref[...].astype(jnp.bfloat16)                       # (H, TB)

    # fc1 + b1 + ReLU   (W1^T lives in slab rows [0, H); its padded columns
    # are zero, matching x^T's zero-padded rows beyond state_size + 2).
    h = jnp.dot(w_ref[0:H, :], x, preferred_element_type=jnp.float32)
    h = jnp.maximum(h + vb_ref[:, 0:1], 0.0)

    # fc2 + b2 + ReLU   (dropout is identity in eval mode).
    h = jnp.dot(w_ref[H:2 * H, :], h.astype(jnp.bfloat16),
                preferred_element_type=jnp.float32)
    h = jnp.maximum(h + vb_ref[:, 1:2], 0.0)

    # fc3 + b3 + ReLU.
    h = jnp.dot(w_ref[2 * H:3 * H, :], h.astype(jnp.bfloat16),
                preferred_element_type=jnp.float32)
    h = jnp.maximum(h + vb_ref[:, 2:3], 0.0)

    # fc4: H -> 1.  VPU multiply + sublane reduce -> lane-dense (1, TB) row.
    q = jnp.sum(h * vb_ref[:, 3:4], axis=0, keepdims=True) + vb_ref[0:1, 4:5]
    o_ref[...] = q.astype(o_ref.dtype)


def init_params(key, state_size, hidden_size):
    """PyTorch-nn.Linear-style init; weights stored [in, out] so y = x @ W + b."""
    dims = [(state_size + 2, hidden_size),
            (hidden_size, hidden_size),
            (hidden_size, hidden_size),
            (hidden_size, 1)]
    params = []
    for fan_in, fan_out in dims:
        key, kw, kb = jax.random.split(key, 3)
        bound = 1.0 / math.sqrt(fan_in)
        w = jax.random.uniform(kw, (fan_in, fan_out), jnp.float32, -bound, bound)
        b = jax.random.uniform(kb, (1, fan_out), jnp.float32, -bound, bound)
        params.append((w, b))
    return params


def pack_params(params, state_size, hidden_size):
    """Pack into a (3H, H) bf16 transposed-weight slab + a (H, 8) f32 block."""
    (w1, b1), (w2, b2), (w3, b3), (w4, b4) = params
    in_dim = state_size + 2
    H = hidden_size
    assert in_dim <= H, "packing assumes state_size + 2 <= hidden_size"

    # W1^T zero-padded along its contraction (column) axis up to H so all
    # three layer slices share the (H, H) shape inside one slab.
    w1t = jnp.zeros((H, H), jnp.float32).at[:, :in_dim].set(w1.T)
    w_slab = jnp.concatenate([w1t, w2.T, w3.T], axis=0).astype(jnp.bfloat16)

    vb = jnp.zeros((H, 8), jnp.float32)
    vb = vb.at[:, 0].set(b1.reshape(-1))
    vb = vb.at[:, 1].set(b2.reshape(-1))
    vb = vb.at[:, 2].set(b3.reshape(-1))
    vb = vb.at[:, 3].set(w4.reshape(-1))
    vb = vb.at[0, 4].set(b4[0, 0])
    return w_slab, vb


def qnetwork_forward(state, action, w_slab, vb, *, hidden_size,
                     max_batch_tile=512):
    """state: (B, state_size), action: (B, 2) -> (B, 1) Q-values.

    Single grid step when B <= max_batch_tile (best on 1-TC v5e/v6e); for
    larger batches the lane axis is split into 128-aligned 'parallel' tiles
    (set max_batch_tile ~ B/2 on v7x so each TensorCore takes half).
    """
    B = state.shape[0]
    in_dim = state.shape[1] + action.shape[1]
    H = hidden_size

    if B <= max_batch_tile:
        tb, b_pad = B, B                      # one full-extent block, grid = 1
    else:
        tb = _round_up(min(max_batch_tile, B), 128)   # lane-tiled: 128-aligned
        b_pad = _round_up(B, tb)
    grid = b_pad // tb

    # Minimal wrapper-side prep: one concat, one transpose, one pad.  The
    # f32 -> bf16 cast happens inside the kernel.
    x = jnp.concatenate([state, action], axis=1)                  # (B, in_dim)
    x_t = jnp.pad(x.T, ((0, H - in_dim), (0, b_pad - B)))         # (H, b_pad)

    kernel = functools.partial(qnetwork_kernel, hidden=H)

    q_row = pl.pallas_call(
        kernel,
        out_shape=jax.ShapeDtypeStruct((1, b_pad), jnp.float32),
        grid=(grid,),
        in_specs=[
            pl.BlockSpec((H, tb), lambda i: (0, i)),        # x^T: batch on lanes
            pl.BlockSpec((3 * H, H), lambda i: (0, 0)),     # weights: resident
            pl.BlockSpec((H, 8), lambda i: (0, 0)),         # biases/w4: resident
        ],
        out_specs=pl.BlockSpec((1, tb), lambda i: (0, i)),  # lane-dense output
        compiler_params=pltpu.CompilerParams(
            dimension_semantics=("parallel",)),
    )(x_t, w_slab, vb)

    return q_row[0, :B].reshape(B, 1)


def reference_forward(state, action, params):
    """Pure-JAX reference with the same bf16-matmul / f32-accumulate recipe."""
    (w1, b1), (w2, b2), (w3, b3), (w4, b4) = params
    bf = lambda a: a.astype(jnp.bfloat16)
    x = jnp.concatenate([state, action], axis=1)
    h = jnp.maximum(jnp.dot(bf(x), bf(w1), preferred_element_type=jnp.float32)
                    + b1, 0.0)
    h = jnp.maximum(jnp.dot(bf(h), bf(w2), preferred_element_type=jnp.float32)
                    + b2, 0.0)
    h = jnp.maximum(jnp.dot(bf(h), bf(w3), preferred_element_type=jnp.float32)
                    + b3, 0.0)
    return jnp.dot(h, w4) + b4


if __name__ == "__main__":
    # Small shapes consistent with the module: 8x8 N-Queens board state,
    # action = (row, col) pair, modest hidden size.
    batch = 8
    state_size = 8
    hidden_size = 32

    key = jax.random.PRNGKey(0)
    k_state, k_action, k_params, k_state2, k_action2 = jax.random.split(key, 5)

    state = jax.random.normal(k_state, (batch, state_size), jnp.float32)
    action = jax.random.normal(k_action, (batch, 2), jnp.float32)
    params = init_params(k_params, state_size, hidden_size)
    w_slab, vb = pack_params(params, state_size, hidden_size)

    # --- single grid step (B=8): full-extent block, lane-dense output ---
    q = qnetwork_forward(state, action, w_slab, vb, hidden_size=hidden_size)
    q = jax.block_until_ready(q)
    q_ref = reference_forward(state, action, params)
    assert q.shape == (batch, 1)
    assert jnp.allclose(q, q_ref, atol=1e-3, rtol=1e-3), "mismatch (B=8)"

    # --- lane-tiled path (B=200, two 128-wide parallel tiles; the split a
    #     v7x would use so each TensorCore takes half the batch) ---
    big_b = 200
    state2 = jax.random.normal(k_state2, (big_b, state_size), jnp.float32)
    action2 = jax.random.normal(k_action2, (big_b, 2), jnp.float32)
    q2 = qnetwork_forward(state2, action2, w_slab, vb,
                          hidden_size=hidden_size, max_batch_tile=128)
    q2 = jax.block_until_ready(q2)
    q2_ref = reference_forward(state2, action2, params)
    assert q2.shape == (big_b, 1)
    assert jnp.allclose(q2, q2_ref, atol=1e-3, rtol=1e-3), "mismatch (B=200)"

    print("KERNEL_OK")
</pallas_src>

<mosaic_0001>
module attributes {stable_mosaic.version = 11 : i64} {
  func.func @qnetwork_kernel(%arg0: i32, %arg1: memref<32x8xf32, #tpu.memory_space<vmem>>, %arg2: memref<96x32xbf16, #tpu.memory_space<vmem>>, %arg3: memref<32x8xf32, #tpu.memory_space<vmem>>, %arg4: memref<1x8xf32, #tpu.memory_space<vmem>>) attributes {dimension_semantics = [#tpu.dimension_semantics<parallel>], iteration_bounds = array<i64: 1>, scalar_prefetch = 0 : i64, scratch_operands = 0 : i64, tpu.core_type = #tpu.core_type<tc>, window_params = [{transform_indices = @transform_0, window_bounds = array<i64: 32, 8>}, {pipeline_mode = #tpu.pipeline_mode<synchronous>, transform_indices = @transform_1, window_bounds = array<i64: 96, 32>}, {pipeline_mode = #tpu.pipeline_mode<synchronous>, transform_indices = @transform_2, window_bounds = array<i64: 32, 8>}, {transform_indices = @transform_3, window_bounds = array<i64: 1, 8>}]} {
    %c0 = arith.constant 0 : index
    %c0_0 = arith.constant 0 : index
    %0 = vector.load %arg1[%c0, %c0_0] : memref<32x8xf32, #tpu.memory_space<vmem>>, vector<32x8xf32>
    %1 = arith.truncf %0 : vector<32x8xf32> to vector<32x8xbf16>
    %c0_1 = arith.constant 0 : index
    %c0_2 = arith.constant 0 : index
    %2 = vector.load %arg2[%c0_1, %c0_2] : memref<96x32xbf16, #tpu.memory_space<vmem>>, vector<32x32xbf16>
    %cst = arith.constant dense<0.000000e+00> : vector<32x8xf32>
    %3 = tpu.matmul %2, %1, %cst {dimension_numbers = #tpu.dot_dimension_numbers<[1], [0], [0], [1], [0, 0, 1, 1], [], []>} : vector<32x32xbf16>, vector<32x8xbf16>, vector<32x8xf32> -> vector<32x8xf32>
    %c0_3 = arith.constant 0 : index
    %c0_4 = arith.constant 0 : index
    %4 = vector.load %arg3[%c0_3, %c0_4] : memref<32x8xf32, #tpu.memory_space<vmem>>, vector<32x1xf32>
    %5 = vector.broadcast %4 : vector<32x1xf32> to vector<32x8xf32>
    %6 = arith.addf %3, %5 : vector<32x8xf32>
    %cst_5 = arith.constant 0.000000e+00 : f32
    %7 = vector.broadcast %cst_5 : f32 to vector<32x8xf32>
    %8 = arith.maximumf %6, %7 : vector<32x8xf32>
    %c32 = arith.constant 32 : index
    %c0_6 = arith.constant 0 : index
    %9 = vector.load %arg2[%c32, %c0_6] : memref<96x32xbf16, #tpu.memory_space<vmem>>, vector<32x32xbf16>
    %10 = arith.truncf %8 : vector<32x8xf32> to vector<32x8xbf16>
    %cst_7 = arith.constant dense<0.000000e+00> : vector<32x8xf32>
    %11 = tpu.matmul %9, %10, %cst_7 {dimension_numbers = #tpu.dot_dimension_numbers<[1], [0], [0], [1], [0, 0, 1, 1], [], []>} : vector<32x32xbf16>, vector<32x8xbf16>, vector<32x8xf32> -> vector<32x8xf32>
    %c0_8 = arith.constant 0 : index
    %c1 = arith.constant 1 : index
    %12 = vector.load %arg3[%c0_8, %c1] : memref<32x8xf32, #tpu.memory_space<vmem>>, vector<32x1xf32>
    %13 = vector.broadcast %12 : vector<32x1xf32> to vector<32x8xf32>
    %14 = arith.addf %11, %13 : vector<32x8xf32>
    %cst_9 = arith.constant 0.000000e+00 : f32
    %15 = vector.broadcast %cst_9 : f32 to vector<32x8xf32>
    %16 = arith.maximumf %14, %15 : vector<32x8xf32>
    %c64 = arith.constant 64 : index
    %c0_10 = arith.constant 0 : index
    %17 = vector.load %arg2[%c64, %c0_10] : memref<96x32xbf16, #tpu.memory_space<vmem>>, vector<32x32xbf16>
    %18 = arith.truncf %16 : vector<32x8xf32> to vector<32x8xbf16>
    %cst_11 = arith.constant dense<0.000000e+00> : vector<32x8xf32>
    %19 = tpu.matmul %17, %18, %cst_11 {dimension_numbers = #tpu.dot_dimension_numbers<[1], [0], [0], [1], [0, 0, 1, 1], [], []>} : vector<32x32xbf16>, vector<32x8xbf16>, vector<32x8xf32> -> vector<32x8xf32>
    %c0_12 = arith.constant 0 : index
    %c2 = arith.constant 2 : index
    %20 = vector.load %arg3[%c0_12, %c2] : memref<32x8xf32, #tpu.memory_space<vmem>>, vector<32x1xf32>
    %21 = vector.broadcast %20 : vector<32x1xf32> to vector<32x8xf32>
    %22 = arith.addf %19, %21 : vector<32x8xf32>
    %cst_13 = arith.constant 0.000000e+00 : f32
    %23 = vector.broadcast %cst_13 : f32 to vector<32x8xf32>
    %24 = arith.maximumf %22, %23 : vector<32x8xf32>
    %c0_14 = arith.constant 0 : index
    %c3 = arith.constant 3 : index
    %25 = vector.load %arg3[%c0_14, %c3] : memref<32x8xf32, #tpu.memory_space<vmem>>, vector<32x1xf32>
    %26 = vector.broadcast %25 : vector<32x1xf32> to vector<32x8xf32>
    %27 = arith.mulf %24, %26 : vector<32x8xf32>
    %cst_15 = arith.constant dense<0.000000e+00> : vector<8xf32>
    %28 = vector.multi_reduction <add>, %27, %cst_15 [0] : vector<32x8xf32> to vector<8xf32>
    %29 = vector.shape_cast %28 : vector<8xf32> to vector<1x8xf32>
    %c0_16 = arith.constant 0 : index
    %c4 = arith.constant 4 : index
    %30 = vector.load %arg3[%c0_16, %c4] : memref<32x8xf32, #tpu.memory_space<vmem>>, vector<1x1xf32>
    %31 = vector.broadcast %30 : vector<1x1xf32> to vector<1x8xf32>
    %32 = arith.addf %29, %31 : vector<1x8xf32>
    %c0_17 = arith.constant 0 : index
    %c0_18 = arith.constant 0 : index
    %33 = vector.load %arg4[%c0_17, %c0_18] : memref<1x8xf32, #tpu.memory_space<vmem>>, vector<1x8xf32>
    tpu.vector_store %arg4[%c0_17, %c0_18], %32 {strides = array<i32>} : memref<1x8xf32, #tpu.memory_space<vmem>>, vector<1x8xf32>,
    return
  }
  func.func @transform_0(%arg0: i32) -> (i32, i32) {
    %c0_i32 = arith.constant 0 : i32
    %c0_i32_0 = arith.constant 0 : i32
    return %c0_i32, %arg0 : i32, i32
  }
  func.func @transform_1(%arg0: i32) -> (i32, i32) {
    %c0_i32 = arith.constant 0 : i32
    %c0_i32_0 = arith.constant 0 : i32
    %c0_i32_1 = arith.constant 0 : i32
    return %c0_i32, %c0_i32_0 : i32, i32
  }
  func.func @transform_2(%arg0: i32) -> (i32, i32) {
    %c0_i32 = arith.constant 0 : i32
    %c0_i32_0 = arith.constant 0 : i32
    %c0_i32_1 = arith.constant 0 : i32
    return %c0_i32, %c0_i32_0 : i32, i32
  }
  func.func @transform_3(%arg0: i32) -> (i32, i32) {
    %c0_i32 = arith.constant 0 : i32
    %c0_i32_0 = arith.constant 0 : i32
    return %c0_i32, %arg0 : i32, i32
  }
}

</mosaic_0001>

<bundles_post_ra>
// kernel: tpu_custom_call.1
= control target key start
LH: loop header
LB: loop body
LE: loop exit
PB: predicated region body
PF: predicated region fallthrough
CT: control target
= control target key end

     0   :  { %vm60_vm0 = vcmask 261120   ;;  %v453_v5 = vmov 0   ;;  %s548_s0 = inlined_call_operand.vmem [shape: f32[32,8], index: 0, kind: input, shape index: {}]   ;;  %s549_s1 = inlined_call_operand.vmem [shape: bf16[96,32], index: 1, kind: input, shape index: {}]   ;;  %s550_s2 = inlined_call_operand.vmem [shape: f32[32,8], index: 2, kind: input, shape index: {}]   ;;  %s551_s3 = inlined_call_operand.hbm [shape: f32[1,8], index: 3, kind: output, shape index: {}]  }
   0x1   :  { %v16_v0 = vld [vmem:[%s548_s0] sm:$0xff]  ;;  %v17_v1 = vld [vmem:[%s548_s0 + $0x8] sm:$0xff]  ;;  %v18_v2 = vld [vmem:[%s548_s0 + $0x10] sm:$0xff]  ;;  %413 = vset.pattern.permute.xlu0 %v453_v5  ;;  %414 = vset.pattern.permute.xlu1 %v453_v5 }
   0x2   :  { %v20_v3 = vpack.c.bf16 %v17_v1, %v16_v0  ;;  %v19_v4 = vld [vmem:[%s548_s0 + $0x18] sm:$0xff]  ;;  %v423_v7 = vld [vmem:[%s549_s1] sm:$0xff]   ;;  %v500_v9 = vld [vmem:[%s550_s2 + $0x10] sm:$0xff] }
   0x3   :  { %v21_v6 = vpack.c.bf16 %v19_v4, %v18_v2  ;;  %v26_v8 = vld [vmem:[%s550_s2] sm:$0xff]  ;;  %387 = vmatprep.mubr.msk.bf16.mxu0 %vm60_vm0, %v423_v7  ;;  %v27_v10 = vld [vmem:[%s550_s2 + $0x8] sm:$0xff]  ;;  %42 = vperm.xlu1 %414, %v500_v9   ;;  %v29_v12 = vld [vmem:[%s550_s2 + $0x18] sm:$0xff] }
   0x4   :  { %383 = vmatprep.subr.bf16.mxu0 %v20_v3  ;;  %v424_v11 = vld [vmem:[%s549_s1 + $0x8] sm:$0xff]   ;;  %32 = vperm.xlu0 %413, %v26_v8  }
   0x5   :  { %384 = vmatpush3.bf16.msra.mxu0 %v20_v3 }
   0x6   :  { %385 = vmatprep.subr.bf16.mxu0 %v21_v6 }
   0x7   :  { %8 = vsyncpa [#allocation3], 0  ;;  %47 = vperm.xlu1 %414, %v29_v12   ;;  %v425_v13 = vld [vmem:[%s549_s1 + $0x10] sm:$0xff]   ;;  %v454_v14 = vmov 1   ;;  %v426_v33 = vld [vmem:[%s549_s1 + $0x18] sm:$0xff]   ;;  %v455_v35 = vmov 2  }
   0x8   :  { %37 = vperm.xlu0 %413, %v27_v10   ;;  %395 = vmatprep.mubr.msk.bf16.mxu1 %vm60_vm0, %v425_v13  ;;  %v427_v34 = vld [vmem:[%s549_s1 + $0x20] sm:$0xff]   ;;  %v456_v36 = vmov 3   ;;  %v457_v37 = vmov 4   ;;  %v428_v57 = vld [vmem:[%s549_s1 + $0x28] sm:$0xff]   ;;  %vm322_vm1 = vcmask 64512   ;;  %s458_s1 = smov [#allocation2]  }
   0x9   :  { %386 = vmatpush3.bf16.msra.mxu0 %v21_v6  ;;  %v336_v38 = vld [vmem:[%s550_s2] sm:$0x1]  ;;  %s351_s13 = sshll.u32 %s458_s1, 4  ;;  %vm343_vm2 = vcmask 57344   ;;  %s352_s13 = int_to_ptr.vmem [resolvable:$true] %s351_s13 }
   0xa   :  { %s429_s14 = scalar_lea.vmem %s352_s13, 16  ;;  %s433_s15 = scalar_lea.vmem %s352_s13, 32 }
   0xb   :  { %416 = vset.pattern.permute.xlu1 %v454_v14  ;;  %p430_p0 = scmp.ne.s32.totalorder %s352_s13, %s429_s14  ;;  %p434_p1 = scmp.lt.s32.totalorder %s352_s13, %s352_s13 }
   0xc   :  { %388 = vmatmul.mubr.msk.bf16.vlgmr.msra.gmra.mrb[0].mxu0 %vm60_vm0, %v424_v11  ;;  %415 = vset.pattern.permute.xlu0 %v454_v14  ;;  %p435_p2 = scmp.lt.s32.totalorder %s433_s15, %s429_s14 }
   0xd   :  { %131 = vperm.xlu1 %416, %v27_v10   ;;  %127 = vperm.xlu0 %415, %v26_v8  }
   0xe   :  { %403 = vmatprep.mubr.msk.bf16.mxu0 %vm60_vm0, %v427_v34  ;;  %p436_p3 = por %p435_p2, %p434_p1 }
  0x10   :  { %p437_p4 = pnand %p436_p3, %p430_p0 }
  0x11   :  { %135 = vperm.xlu1 %416, %v500_v9   ;;  %139 = vperm.xlu0 %415, %v29_v12  }
  0x15   :  { %417 = vset.pattern.permute.xlu1 %v455_v35  ;;  %418 = vset.pattern.permute.xlu0 %v455_v35 }
  0x16   :  { %218 = vperm.xlu1 %417, %v26_v8   ;;  %222 = vperm.xlu0 %418, %v27_v10  }
  0x1a   :  { %226 = vperm.xlu1 %417, %v500_v9   ;;  %419 = vset.pattern.permute.xlu0 %v456_v36 }
  0x1b   :  { %303 = vperm.xlu0 %419, %v26_v8  }
  0x1e   :  { %230 = vperm.xlu1 %417, %v29_v12  }
  0x1f   :  { %315 = vperm.xlu0 %419, %v29_v12  }
  0x22   :  { %420 = vset.pattern.permute.xlu1 %v456_v36 }
  0x23   :  { %307 = vperm.xlu1 %420, %v27_v10   ;;  %422 = vset.pattern.permute.xlu0 %v457_v37 }
  0x27   :  { %311 = vperm.xlu1 %420, %v500_v9  }
  0x2b   :  { %421 = vset.pattern.permute.xlu1 %v457_v37 }
  0x2c   :  { %339 = vperm.xlu1 %421, %v336_v38  }
  0x82   :  { %v43_v15 = vpop.permute.xlu1 %42 }
  0x83   :  { %v33_v16 = vpop.permute.xlu0 %32 }
  0x86   :  { %v48_v18 = vpop.permute.xlu1 %47 }
  0x87   :  { %v38_v23 = vpop.permute.xlu0 %37 }
  0x8c   :  { %v132_v39 = vpop.permute.xlu1 %131  ;;  %v128_v40 = vpop.permute.xlu0 %127 }
  0x90   :  { %v136_v41 = vpop.permute.xlu1 %135  ;;  %v140_v43 = vpop.permute.xlu0 %139 }
  0x95   :  { %v219_v58 = vpop.permute.xlu1 %218  ;;  %v223_v61 = vpop.permute.xlu0 %222 }
  0x99   :  { %v227_v59 = vpop.permute.xlu1 %226 }
  0x9a   :  { %v304_v2 = vpop.permute.xlu0 %303 }
  0x9d   :  { %v231_v60 = vpop.permute.xlu1 %230 }
  0x9e   :  { %v316_v14 = vpop.permute.xlu0 %315 }
  0xa2   :  { %v308_v62 = vpop.permute.xlu1 %307 }
  0xa6   :  { %v312_v10 = vpop.permute.xlu1 %311 }
  0xdf   :  { %v389_v17 = vpop.f32.mrb[0].mxu0 }
  0xe0   :  { %v110_v19 = vadd.f32 %v389_v17, %v43_v15  ;;  %v101_v20 = vpop.f32.mrb[1].mxu0 }
  0xe1   :  { %v102_v21 = vadd.f32 %v101_v20, %v33_v16  ;;  %v390_v22 = vpop.f32.mrb[2].mxu0 }
  0xe2   :  { %v113_v24 = vadd.f32 %v390_v22, %v48_v18  ;;  %v104_v25 = vpop.f32.mrb[3].mxu0  ;;  %v118_v27 = vmax.f32 %v110_v19, 0.0 }
  0xe3   :  { %v105_v26 = vadd.f32 %v104_v25, %v38_v23  ;;  %v116_v29 = vmax.f32 %v102_v21, 0.0 }
  0xe4   :  { %v119_v28 = vmax.f32 %v113_v24, 0.0 }
  0xe5   :  { %v117_v30 = vmax.f32 %v105_v26, 0.0 }
  0xe6   :  { %v125_v31 = vpack.c.bf16 %v119_v28, %v118_v27 }
  0xe7   :  { %v124_v32 = vpack.c.bf16 %v117_v30, %v116_v29  ;;  %v340_v30 = vpop.permute.xlu1 %339 }
  0xe9   :  { %391 = vmatprep.subr.bf16.mxu1 %v124_v32 }
  0xea   :  { %392 = vmatpush3.bf16.msra.mxu1 %v124_v32 }
  0xeb   :  { %393 = vmatprep.subr.bf16.mxu1 %v125_v31 }
  0xee   :  { %394 = vmatpush3.bf16.msra.mxu1 %v125_v31 }
  0xf1   :  { %396 = vmatmul.mubr.msk.bf16.vlgmr.msra.gmra.mrb[0].mxu1 %vm60_vm0, %v426_v33 }
 0x1c4   :  { %v397_v42 = vpop.f32.mrb[0].mxu1 }
 0x1c5   :  { %v201_v44 = vadd.f32 %v397_v42, %v136_v41  ;;  %v192_v45 = vpop.f32.mrb[1].mxu1 }
 0x1c6   :  { %v193_v46 = vadd.f32 %v192_v45, %v128_v40  ;;  %v398_v47 = vpop.f32.mrb[2].mxu1 }
 0x1c7   :  { %v204_v48 = vadd.f32 %v398_v47, %v140_v43  ;;  %v195_v49 = vpop.f32.mrb[3].mxu1  ;;  %v209_v51 = vmax.f32 %v201_v44, 0.0 }
 0x1c8   :  { %v196_v50 = vadd.f32 %v195_v49, %v132_v39  ;;  %v207_v53 = vmax.f32 %v193_v46, 0.0 }
 0x1c9   :  { %v210_v52 = vmax.f32 %v204_v48, 0.0 }
 0x1ca   :  { %v208_v54 = vmax.f32 %v196_v50, 0.0 }
 0x1cb   :  { %v216_v55 = vpack.c.bf16 %v210_v52, %v209_v51 }
 0x1cc   :  { %v215_v56 = vpack.c.bf16 %v208_v54, %v207_v53 }
 0x1ce   :  { %399 = vmatprep.subr.bf16.mxu0 %v215_v56 }
 0x1cf   :  { %400 = vmatpush3.bf16.msra.mxu0 %v215_v56 }
 0x1d0   :  { %401 = vmatprep.subr.bf16.mxu0 %v216_v55 }
 0x1d3   :  { %402 = vmatpush3.bf16.msra.mxu0 %v216_v55 }
 0x1d6   :  { %404 = vmatmul.mubr.msk.bf16.vlgmr.msra.gmra.mrb[4].mxu0 %vm60_vm0, %v428_v57 }
 0x2a9   :  { %v405_v63 = vpop.f32.mrb[4].mxu0 }
 0x2aa   :  { %v292_v0 = vadd.f32 %v405_v63, %v227_v59  ;;  %v283_v1 = vpop.f32.mrb[5].mxu0 }
 0x2ab   :  { %v284_v3 = vadd.f32 %v283_v1, %v219_v58  ;;  %v406_v4 = vpop.f32.mrb[6].mxu0 }
 0x2ac   :  { %v295_v5 = vadd.f32 %v406_v4, %v231_v60  ;;  %v286_v6 = vpop.f32.mrb[7].mxu0  ;;  %v300_v7 = vmax.f32 %v292_v0, 0.0 }
 0x2ad   :  { %v298_v8 = vmax.f32 %v284_v3, 0.0  ;;  %v287_v9 = vadd.f32 %v286_v6, %v223_v61 }
 0x2ae   :  { %v301_v12 = vmax.f32 %v295_v5, 0.0  ;;  %v320_v16 = vmul.f32 %v312_v10, %v300_v7 }
 0x2af   :  { %v318_v11 = vmul.f32 %v304_v2, %v298_v8  ;;  %v299_v13 = vmax.f32 %v287_v9, 0.0 }
 0x2b0   :  { %v321_v19 = vmul.f32 %v316_v14, %v301_v12  ;;  %v326_v21 = vsel %vm322_vm1, %v320_v16, 0.0 }
 0x2b1   :  { %v319_v15 = vmul.f32 %v308_v62, %v299_v13  ;;  %v323_v17 = vsel %vm322_vm1, %v318_v11, 0.0 }
 0x2b2   :  { %v328_v23 = vsel %vm322_vm1, %v321_v19, 0.0 }
 0x2b3   :  { %v324_v18 = vsel %vm322_vm1, %v319_v15, 0.0 }
 0x2b4   :  { %v325_v20 = vadd.f32 %v324_v18, %v323_v17 }
 0x2b6   :  { %v327_v22 = vadd.f32 %v326_v21, %v325_v20 }
 0x2b8   :  { %v329_v24 = vadd.f32 %v328_v23, %v327_v22 }
 0x2ba   :  { %v330_v25 = vrot.slane %v329_v24, 4 }
 0x2bc   :  { %v331_v26 = vadd.f32 %v330_v25, %v329_v24 }
 0x2be   :  { %v332_v27 = vrot.slane %v331_v26, 2 }
 0x2c0   :  { %v333_v28 = vadd.f32 %v332_v27, %v331_v26 }
 0x2c2   :  { %v334_v29 = vrot.slane %v333_v28, 1 }
 0x2c4   :  { %v335_v31 = vadd.f32 %v334_v29, %v333_v28 }
 0x2c6   :  { %v342_v32 = vadd.f32 %v340_v30, %v335_v31 }
 0x2c8   :  { %344 = vst.msk [vmem:[#allocation2] sm:$0x1] %vm343_vm2, %v342_v32 }
 0x2c9   :  { %440 = shalt.err (!%p437_p4)
}
 0x2ca   :  { %s441_s18 = scalar_lea.hbm %s551_s3, 16 }
 0x2cb   :  { %p442_p5 = scmp.ne.s32.totalorder %s551_s3, %s441_s18  ;;  %p445_p6 = scmp.lt.u32.totalorder %s441_s18, %s551_s3 }
 0x2cd   :  { %p447_p7 = pnand %p445_p6, %p442_p5 }
 0x2cf   :  { %450 = shalt.err (!%p447_p7)
}
 0x2d0   :  { %354 = dma.vmem_to_hbm [thread:$0]  %s352_s13, 16, %s551_s3, [#allocation3]  }
 0x2d1   :  { %451 = dma.done.wait [#allocation3], 16  }
 0x2d2   :  { %452 = vsyncadd [#allocation3], 4294967280 }
 0x2d3   :  { %358 = vsyncpa [#allocation3], 1 }

</bundles_post_ra>
